<compile_context>
chip_gen: v7x
topology: tpu7x:2x2x1
jax: 0.10.0
libtpu: 0.0.40
codegen_flags: <defaults>
</compile_context>

<pallas_src>
import functools

import jax
import jax.numpy as jnp
from jax import lax
from jax.experimental import pallas as pl
from jax.experimental.pallas import tpu as pltpu

_LANES = 128
_SUBLANES = 8
_TILE_ELEMS = _SUBLANES * _LANES  # 1024


def _round_up(a: int, b: int) -> int:
    return ((a + b - 1) // b) * b


def _stable_bce_kernel(x_ref, t_ref, out_ref, *, rows_block, n_valid,
                       last_block_ragged):
    # Cast to f32 in VMEM (keeps HBM reads at native width for bf16/fp16).
    x = x_ref[...].astype(jnp.float32)
    t = t_ref[...].astype(jnp.float32)

    neg_abs = -jnp.abs(x)
    # Match PyTorch literally: clamp(x, 0) - x*t + (1 + exp(-|x|)).log()
    loss = jnp.maximum(x, 0.0) - x * t + jnp.log(1.0 + jnp.exp(neg_abs))

    # nanmean: count only non-NaN loss elements.
    nan_ok = jnp.logical_not(jnp.isnan(loss))

    fold = rows_block // _SUBLANES

    def write(valid):
        loss_m = jnp.where(valid, loss, 0.0)
        cnt_m = valid.astype(jnp.float32)
        # Fold rows -> 8 sublanes with vreg adds only (no per-step XLU reduce,
        # no masked single-lane stores).  Final cross-lane reduce is outside.
        out_ref[0, 0, :, :] = jnp.sum(
            loss_m.reshape(fold, _SUBLANES, _LANES), axis=0)
        out_ref[0, 1, :, :] = jnp.sum(
            cnt_m.reshape(fold, _SUBLANES, _LANES), axis=0)

    if last_block_ragged:
        # Only the (single) partial boundary block pays for the index mask.
        i = pl.program_id(0)
        is_last = i == pl.num_programs(0) - 1

        @pl.when(jnp.logical_not(is_last))
        def _():
            write(nan_ok)

        @pl.when(is_last)
        def _():
            row_ids = lax.broadcasted_iota(jnp.int32, (rows_block, _LANES), 0)
            lane_ids = lax.broadcasted_iota(jnp.int32, (rows_block, _LANES), 1)
            local_idx = row_ids * _LANES + lane_ids
            remaining = n_valid - i * (rows_block * _LANES)
            in_bounds = local_idx < remaining
            write(jnp.logical_and(in_bounds, nan_ok))
    else:
        write(nan_ok)


def _jax_partial(xf, tf):
    """Pure-JAX nansum/count of the StableBCE loss (used for the ragged tail)."""
    x = xf.astype(jnp.float32)
    t = tf.astype(jnp.float32)
    loss = jnp.maximum(x, 0.0) - x * t + jnp.log(1.0 + jnp.exp(-jnp.abs(x)))
    valid = jnp.logical_not(jnp.isnan(loss))
    return (jnp.sum(jnp.where(valid, loss, 0.0)),
            jnp.sum(valid).astype(jnp.float32))


def stable_bce_loss(inp: jax.Array, target: jax.Array) -> jax.Array:
    """nanmean(clamp(x,0) - x*t + log(1+exp(-|x|))) over all elements."""
    assert inp.shape == target.shape
    x = inp.reshape(-1)        # native dtype; layout-preserving, no HBM copy
    t = target.reshape(-1)
    n = x.size                 # static Python int

    n_main = (n // _TILE_ELEMS) * _TILE_ELEMS   # aligned prefix for the kernel
    n_tail = n - n_main                         # <1024 ragged tail, pure JAX

    total = jnp.zeros((), jnp.float32)
    count = jnp.zeros((), jnp.float32)

    if n_main:
        rows = n_main // _LANES          # multiple of 8 by construction
        x2 = x[:n_main].reshape(rows, _LANES)
        t2 = t[:n_main].reshape(rows, _LANES)

        itemsize = jnp.dtype(x.dtype).itemsize
        # Dtype-aware tile: native-dtype pipeline buffers are half the size for
        # bf16/fp16, so double the row count for the same VMEM footprint.
        max_rows_block = 4096 if itemsize < 4 else 2048
        # At least 2 grid blocks whenever rows permits (v7x megacore sharding),
        # big tiles otherwise.
        rows_block = max(
            _SUBLANES,
            min(max_rows_block, _round_up(pl.cdiv(rows, 2), _SUBLANES), rows))
        num_blocks = pl.cdiv(rows, rows_block)
        last_block_ragged = (rows % rows_block) != 0

        kernel = functools.partial(
            _stable_bce_kernel,
            rows_block=rows_block,
            n_valid=n_main,
            last_block_ragged=last_block_ragged,
        )

        out_bytes = num_blocks * 2 * _SUBLANES * _LANES * 4
        cost = pl.CostEstimate(
            flops=6 * n_main,
            transcendentals=2 * n_main,          # exp + log per element
            bytes_accessed=2 * n_main * itemsize + out_bytes,
        )

        partials = pl.pallas_call(
            kernel,
            out_shape=jax.ShapeDtypeStruct(
                (num_blocks, 2, _SUBLANES, _LANES), jnp.float32),
            grid_spec=pltpu.PrefetchScalarGridSpec(
                num_scalar_prefetch=0,
                grid=(num_blocks,),
                in_specs=[
                    pl.BlockSpec((rows_block, _LANES), lambda i: (i, 0)),
                    pl.BlockSpec((rows_block, _LANES), lambda i: (i, 0)),
                ],
                out_specs=pl.BlockSpec(
                    (1, 2, _SUBLANES, _LANES), lambda i: (i, 0, 0, 0)),
            ),
            compiler_params=pltpu.CompilerParams(
                # No carried state: each grid step owns its output block, so
                # the axis can be sharded across TensorCores (v7x megacore).
                dimension_semantics=("parallel",),
                vmem_limit_bytes=48 * 1024 * 1024,
            ),
            cost_estimate=cost,
        )(x2, t2)

        # Tiny second-stage reduction on the per-block partials.
        total = total + jnp.sum(partials[:, 0])
        count = count + jnp.sum(partials[:, 1])

    if n_tail:
        # Ragged tail (<1024 elements): fold with pure JAX instead of padding
        # (avoids materializing full padded copies of both inputs in HBM).
        ts, tc = _jax_partial(x[n_main:], t[n_main:])
        total = total + ts
        count = count + tc

    # 0/0 -> NaN matches torch.nanmean on an all-NaN input.
    return total / count


def _reference(inp, target):
    x = inp.reshape(-1).astype(jnp.float32)
    t = target.reshape(-1).astype(jnp.float32)
    loss = jnp.maximum(x, 0.0) - x * t + jnp.log(1.0 + jnp.exp(-jnp.abs(x)))
    valid = ~jnp.isnan(loss)
    return jnp.sum(jnp.where(valid, loss, 0.0)) / jnp.sum(valid)


if __name__ == "__main__":
    key = jax.random.PRNGKey(0)
    k1, k2, k3, k4 = jax.random.split(key, 4)

    # logits and binary targets, NCHW layout (aligned case: 2048 elements).
    x = jax.random.normal(k1, (2, 4, 16, 16), dtype=jnp.float32) * 3.0
    t = (jax.random.uniform(k2, (2, 4, 16, 16)) > 0.5).astype(jnp.float32)

    out = stable_bce_loss(x, t)
    jax.block_until_ready(out)
    ref = _reference(x, t)
    assert jnp.allclose(out, ref, rtol=1e-5, atol=1e-6), (out, ref)

    # Ragged case (3200 elements: exercises the pl.when-gated boundary block
    # and the pure-JAX tail) with some NaNs to exercise nanmean.
    x2 = jax.random.normal(k3, (2, 4, 20, 20), dtype=jnp.float32) * 3.0
    x2 = x2.at[0, 1, 3, 5].set(jnp.nan).at[1, 2, 19, 19].set(jnp.nan)
    t2 = (jax.random.uniform(k4, (2, 4, 20, 20)) > 0.5).astype(jnp.float32)

    out2 = stable_bce_loss(x2, t2)
    jax.block_until_ready(out2)
    ref2 = _reference(x2, t2)
    assert jnp.allclose(out2, ref2, rtol=1e-5, atol=1e-6), (out2, ref2)

    print("KERNEL_OK")
</pallas_src>

<mosaic_0001>
module attributes {stable_mosaic.version = 11 : i64} {
  func.func @_stable_bce_kernel(%arg0: i32, %arg1: memref<8x128xf32, #tpu.memory_space<vmem>>, %arg2: memref<8x128xf32, #tpu.memory_space<vmem>>, %arg3: memref<1x2x8x128xf32, #tpu.memory_space<vmem>>) attributes {dimension_semantics = [#tpu.dimension_semantics<parallel>], iteration_bounds = array<i64: 2>, scalar_prefetch = 0 : i64, scratch_operands = 0 : i64, tpu.core_type = #tpu.core_type<tc>, window_params = [{transform_indices = @transform_0, window_bounds = array<i64: 8, 128>}, {transform_indices = @transform_1, window_bounds = array<i64: 8, 128>}, {transform_indices = @transform_2, window_bounds = array<i64: 1, 2, 8, 128>}]} {
    %c0 = arith.constant 0 : index
    %c0_0 = arith.constant 0 : index
    %0 = vector.load %arg1[%c0, %c0_0] : memref<8x128xf32, #tpu.memory_space<vmem>>, vector<8x128xf32>
    %c0_1 = arith.constant 0 : index
    %c0_2 = arith.constant 0 : index
    %1 = vector.load %arg2[%c0_1, %c0_2] : memref<8x128xf32, #tpu.memory_space<vmem>>, vector<8x128xf32>
    %2 = math.absf %0 : vector<8x128xf32>
    %cst = arith.constant 0.000000e+00 : f32
    %3 = vector.broadcast %cst : f32 to vector<8x128xf32>
    %4 = arith.subf %3, %2 : vector<8x128xf32>
    %cst_3 = arith.constant 0.000000e+00 : f32
    %5 = vector.broadcast %cst_3 : f32 to vector<8x128xf32>
    %6 = arith.maximumf %0, %5 : vector<8x128xf32>
    %7 = arith.mulf %0, %1 : vector<8x128xf32>
    %8 = arith.subf %6, %7 : vector<8x128xf32>
    %9 = math.exp %4 : vector<8x128xf32>
    %cst_4 = arith.constant 1.000000e+00 : f32
    %10 = vector.broadcast %cst_4 : f32 to vector<8x128xf32>
    %11 = arith.addf %10, %9 : vector<8x128xf32>
    %12 = math.log %11 : vector<8x128xf32>
    %13 = arith.addf %8, %12 : vector<8x128xf32>
    %14 = arith.cmpf one, %13, %13 : vector<8x128xf32>
    %cst_5 = arith.constant dense<true> : vector<8x128xi1>
    %15 = arith.xori %14, %cst_5 : vector<8x128xi1>
    %cst_6 = arith.constant 0.000000e+00 : f32
    %16 = vector.broadcast %cst_6 : f32 to vector<8x128xf32>
    %17 = arith.select %15, %13, %16 : vector<8x128xi1>, vector<8x128xf32>
    %18 = arith.extui %15 : vector<8x128xi1> to vector<8x128xi32>
    %19 = arith.sitofp %18 : vector<8x128xi32> to vector<8x128xf32>
    %20 = vector.shape_cast %17 : vector<8x128xf32> to vector<1x8x128xf32>
    %cst_7 = arith.constant dense<0.000000e+00> : vector<8x128xf32>
    %21 = vector.multi_reduction <add>, %20, %cst_7 [0] : vector<1x8x128xf32> to vector<8x128xf32>
    %c0_8 = arith.constant 0 : index
    %c0_9 = arith.constant 0 : index
    %c0_10 = arith.constant 0 : index
    %c0_11 = arith.constant 0 : index
    %22 = vector.load %arg3[%c0_8, %c0_9, %c0_10, %c0_11] : memref<1x2x8x128xf32, #tpu.memory_space<vmem>>, vector<1x1x8x128xf32>
    %23 = vector.shape_cast %22 : vector<1x1x8x128xf32> to vector<8x128xf32>
    %24 = vector.shape_cast %21 : vector<8x128xf32> to vector<1x1x8x128xf32>
    tpu.vector_store %arg3[%c0_8, %c0_9, %c0_10, %c0_11], %24 {strides = array<i32>} : memref<1x2x8x128xf32, #tpu.memory_space<vmem>>, vector<1x1x8x128xf32>,
    %25 = vector.shape_cast %19 : vector<8x128xf32> to vector<1x8x128xf32>
    %cst_12 = arith.constant dense<0.000000e+00> : vector<8x128xf32>
    %26 = vector.multi_reduction <add>, %25, %cst_12 [0] : vector<1x8x128xf32> to vector<8x128xf32>
    %c0_13 = arith.constant 0 : index
    %c1 = arith.constant 1 : index
    %c0_14 = arith.constant 0 : index
    %c0_15 = arith.constant 0 : index
    %27 = vector.load %arg3[%c0_13, %c1, %c0_14, %c0_15] : memref<1x2x8x128xf32, #tpu.memory_space<vmem>>, vector<1x1x8x128xf32>
    %28 = vector.shape_cast %27 : vector<1x1x8x128xf32> to vector<8x128xf32>
    %29 = vector.shape_cast %26 : vector<8x128xf32> to vector<1x1x8x128xf32>
    tpu.vector_store %arg3[%c0_13, %c1, %c0_14, %c0_15], %29 {strides = array<i32>} : memref<1x2x8x128xf32, #tpu.memory_space<vmem>>, vector<1x1x8x128xf32>,
    return
  }
  func.func @transform_0(%arg0: i32) -> (i32, i32) {
    %c0_i32 = arith.constant 0 : i32
    %c0_i32_0 = arith.constant 0 : i32
    return %arg0, %c0_i32 : i32, i32
  }
  func.func @transform_1(%arg0: i32) -> (i32, i32) {
    %c0_i32 = arith.constant 0 : i32
    %c0_i32_0 = arith.constant 0 : i32
    return %arg0, %c0_i32 : i32, i32
  }
  func.func @transform_2(%arg0: i32) -> (i32, i32, i32, i32) {
    %c0_i32 = arith.constant 0 : i32
    %c0_i32_0 = arith.constant 0 : i32
    %c0_i32_1 = arith.constant 0 : i32
    %c0_i32_2 = arith.constant 0 : i32
    return %arg0, %c0_i32, %c0_i32_0, %c0_i32_1 : i32, i32, i32, i32
  }
}

</mosaic_0001>

<bundles_post_ra>
// kernel: tpu_custom_call.1
= control target key start
LH: loop header
LB: loop body
LE: loop exit
PB: predicated region body
PF: predicated region fallthrough
CT: control target
= control target key end

     0   :  { %7 = vsyncpa [#allocation3], 0  ;;  %s773_s0 = inlined_call_operand.hbm [shape: f32[16,128], index: 0, kind: input, shape index: {}]   ;;  %s774_s1 = inlined_call_operand.hbm [shape: f32[16,128], index: 1, kind: input, shape index: {}]   ;;  %s775_s2 = inlined_call_operand.hbm [shape: f32[2,2,8,128], index: 2, kind: output, shape index: {}]  }
   0x1   :  { %9 = vsyncpa [#allocation3 + $0x1], 0 }
   0x2   :  { %10 = vsyncpa [#allocation6], 0 }
   0x3   :  { %12 = vsyncpa [#allocation6 + $0x1], 0 }
   0x4   :  { %13 = vsyncpa [#allocation4], 0 }
   0x5   :  { %15 = vsyncpa [#allocation4 + $0x1], 0  ;;  %s561_s9 = smov 0   ;;  %s563_s10 = smov 0  }
   0x6   :  { %s565_s11 = smov 0   ;;  %s567_s12 = smov 0  }
   0x7 LB: > { %s582_s13 = sadd.s32 4294967295, %s537_s12   ;;  %s329_s14 = sadd.s32 4294967294, %s537_s12   ;;  %s537_s12 = sphi %s567_s12, %s794_s12   ;;  %s533_s11 = sphi %s565_s11, %s793_s11   ;;  %s529_s10 = sphi %s563_s10, %s792_s10   ;;  %s525_s9 = sphi %s561_s9, %s791_s9  }
   0x8   : > { %s586_s15 = sadd.s32 1, %s537_s12   ;;  %s28_s16 = sadd.s32 1, %s533_s11 }
   0x9   : > { %s25_s17 = ssub.s32 %s537_s12, %s586_s15  ;;  %p35_p0 = scmp.ne.s32.totalorder %s533_s11, %s529_s10 }
   0xa   : > { %p26_p1 = scmp.eq.s32.totalorder %s25_s17, 0  ;;  %p36_p2 = scmp.eq.s32.totalorder %s537_s12, 0 }
   0xb   : > { %p41_p3 = scmp.ne.s32.totalorder %s529_s10, %s525_s9  ;;  %p42_p4 = scmp.eq.s32.totalorder %s582_s13, 0 }
   0xc   : > { %s598_s18 = scalar_select %p26_p1, %s533_s11, %s28_s16  }
   0xd   : > { %p600_p5 = por %p36_p2, %p35_p0  ;;  %p604_p6 = por %p42_p4, %p41_p3 }
   0xe   : > { %p91_p7 = scmp.eq.s32.totalorder %s582_s13, 1  ;;  %p97_p8 = scmp.eq.s32.totalorder %s329_s14, 1 }
   0xf   : > { %s779_s20 = scalar_select %p604_p6, 1, 0 }
  0x10   : > { %p365_p10 = scmp.lt.s32.totalorder %s537_s12, 2  ;;  %p611_p11 = por %p91_p7, %p35_p0 }
  0x11   : > { %p615_p12 = por %p97_p8, %p41_p3  ;;  %s620_s23 = sand.u32 1, %s533_s11  }
  0x12   : > { %s780_s21 = scalar_select %p611_p11, 1, 0 }
  0x13   : > { %s781_s22 = scalar_select %p615_p12, 1, 0 }
  0x14   : > { %s333_s24 = sshll.u32 %s537_s12, 7  ;;  %s332_s25 = sshll.u32 %s620_s23, 3 }
  0x15   : > { %s629_s28 = scalar_lea.hbm %s773_s0, %s333_s24  ;;  %s121_s29 = scalar_lea.vmem [#allocation2], %s332_s25 }
  0x16   : > { %s128_s30 = sshll.u32 %s121_s29, 4  ;;  %p635_p13 = pnand %p365_p10, %p600_p5  ;;  %s639_s30 = int_to_ptr.vmem [resolvable:$true] %s128_s30 }
  0x17   : > { %s118_s4 = scalar_lea.sflag [#allocation3], %s620_s23  ;;  %s407_s5 = scalar_lea.hbm %s629_s28, 128 }
  0x18   : > { %p408_p2 = scmp.ne.s32.totalorder %s629_s28, %s407_s5  ;;  %p409_p3 = pneg %p635_p13 }
  0x19   : > { %s412_s8 = scalar_lea.hbm %s773_s0, 256  ;;  %p413_p5 = scmp.lt.u32.totalorder %s629_s28, %s773_s0 }
  0x1a   : > { %p410_p4 = pnand %p409_p3, %p408_p2  ;;  %p414_p8 = scmp.lt.u32.totalorder %s412_s8, %s407_s5 }
  0x1b   : > { %p416_p9 = scmp.lt.u32.totalorder %s407_s5, %s629_s28 }
  0x1c   : > { %p411_p7 = pneg %p410_p4  ;;  %p415_p10 = por %p414_p8, %p413_p5 }
  0x1e   : > { %p417_p0 = por %p416_p9, %p415_p10 }
  0x20   : > { %p418_p1 = pnand %p417_p0, %p411_p7 }
  0x22   : > { %421 = shalt.err (!%p418_p1)
}
  0x23   : > { %s422_s17 = scalar_lea.vmem %s639_s30, 128  ;;  %s539_s19 = smov [#allocation2]  }
  0x24   : > { %p423_p2 = scmp.ne.s32.totalorder %s639_s30, %s422_s17  ;;  %s427_s26 = sshll.u32 %s539_s19, 4  ;;  %s428_s26 = int_to_ptr.vmem [resolvable:$false] %s427_s26 }
  0x25   : > { %s429_s27 = scalar_lea.vmem %s428_s26, 256  ;;  %p430_p11 = scmp.lt.s32.totalorder %s639_s30, %s428_s26 }
  0x26   : > { %p425_p4 = pnand %p423_p2, %p409_p3  ;;  %p431_p5 = scmp.lt.s32.totalorder %s429_s27, %s422_s17 }
  0x28   : > { %p426_p12 = pneg %p425_p4  ;;  %p432_p8 = por %p431_p5, %p430_p11 }
  0x2a   : > { %p433_p9 = pnand %p432_p8, %p426_p12 }
  0x2c   : > { %436 = shalt.err (!%p433_p9)
}
  0x2d   : > { %357 = dma.hbm_to_vmem [thread:$0]  (!%p635_p13), %s629_s28, 128, %s639_s30, %s118_s4  }
  0x2e   : > { %p783_p0 = scmp.lt.s32.totalorder %s537_s12, 3  ;;  %p784_p1 = scmp.ge.s32.totalorder %s537_s12, 1 }
  0x2f   : > { %s682_s7 = scalar_lea.hbm %s774_s1, %s333_s24  ;;  %s139_s8 = scalar_lea.vmem [#allocation5], %s332_s25 }
  0x30   : > { %p673_p7 = pnand %p784_p1, %p783_p0  ;;  %s146_s14 = sshll.u32 %s139_s8, 4  ;;  %s147_s14 = int_to_ptr.vmem [resolvable:$true] %s146_s14 }
  0x31   : > { %s136_s28 = scalar_lea.sflag [#allocation6], %s620_s23  ;;  %s437_s30 = scalar_lea.hbm %s682_s7, 128 }
  0x32   : > { %s785_s29 = scalar_select %p673_p7, 1, 0 }
  0x33   : > { %p438_p11 = scmp.ne.s32.totalorder %s682_s7, %s437_s30  ;;  %s442_s24 = scalar_lea.hbm %s774_s1, 256 }
  0x34   : > { %p443_p2 = scmp.lt.u32.totalorder %s682_s7, %s774_s1  ;;  %p444_p4 = scmp.lt.u32.totalorder %s442_s24, %s437_s30 }
  0x35   : > { %p440_p12 = pnand %p438_p11, %p409_p3  ;;  %p446_p8 = scmp.lt.u32.totalorder %s437_s30, %s682_s7 }
  0x36   : > { %p445_p5 = por %p444_p4, %p443_p2 }
  0x37   : > { %p441_p10 = pneg %p440_p12 }
  0x38   : > { %p447_p9 = por %p446_p8, %p445_p5 }
  0x3a   : > { %p448_p0 = pnand %p447_p9, %p441_p10 }
  0x3c   : > { %451 = shalt.err (!%p448_p0)
}
  0x3d   : > { %s452_s23 = scalar_lea.vmem %s147_s14, 128  ;;  %s540_s25 = smov [#allocation5]  }
  0x3e   : > { %p453_p1 = scmp.ne.s32.totalorder %s147_s14, %s452_s23  ;;  %s457_s26 = sshll.u32 %s540_s25, 4  ;;  %s458_s26 = int_to_ptr.vmem [resolvable:$false] %s457_s26 }
  0x3f   : > { %s459_s27 = scalar_lea.vmem %s458_s26, 256  ;;  %p460_p6 = scmp.lt.s32.totalorder %s147_s14, %s458_s26 }
  0x40   : > { %p455_p11 = pnand %p453_p1, %p409_p3  ;;  %p461_p7 = scmp.lt.s32.totalorder %s459_s27, %s452_s23 }
  0x42   : > { %p456_p12 = pneg %p455_p11  ;;  %p462_p2 = por %p461_p7, %p460_p6 }
  0x44   : > { %p463_p4 = pnand %p462_p2, %p456_p12 }
  0x46   : > { %466 = shalt.err (!%p463_p4)
}
  0x47   : > { %360 = dma.hbm_to_vmem [thread:$0]  (!%p635_p13), %s682_s7, 128, %s147_s14, %s136_s28  }
  0x48   : > { %p786_p10 = scmp.ne.s32.totalorder %s785_s29, 0 }
  0x49   : > { %s709_s5 = sand.u32 (!%p786_p10), 1, %s529_s10   ;;  %p787_p3 = scmp.ne.s32.totalorder (!%p786_p10), %s779_s20, 0 }
  0x4a   : > { %155 = sbr.rel (%p786_p10) target bundleno = 137 (0x89), region = 28  ;;  %s337_s6 = sshll.u32 (!%p786_p10), %s709_s5, 3 }
  0x4b   : > { %s158_s8 = scalar_lea.sflag (!%p786_p10), [#allocation3], %s709_s5  ;;  %s161_s30 = scalar_lea.vmem (!%p786_p10), [#allocation2], %s337_s6 }
  0x51   : > { %512 = dma.done.wait (%p787_p3), %s158_s8, 128  }
  0x52   : > { %514 = vsyncadd (%p787_p3), %s158_s8, 4294967168  ;;  %s167_s3 = scalar_lea.sflag [#allocation6], %s709_s5  ;;  %s170_s7 = scalar_lea.vmem [#allocation5], %s337_s6 }
  0x53   : > { %516 = dma.done.wait (%p787_p3), %s167_s3, 128  }
  0x54   : > { %518 = vsyncadd (%p787_p3), %s167_s3, 4294967168  ;;  %v196_v0 = vld [vmem:[%s161_s30] sm:$0xff]  ;;  %v197_v6 = vld [vmem:[%s170_s7] sm:$0xff]  ;;  %s339_s29 = sshll.u32 %s709_s5, 4  ;;  %s347_s28 = sshll.u32 %s582_s13, 8  ;;  %vm541_vm1 = vmmov 1  }
  0x55   : > { %v198_v1 = vand.u32 2147483647, %v196_v0  ;;  %v200_v7 = vmax.f32 %v196_v0, 0.0  ;;  %v201_v8 = vmul.f32 %v197_v6, %v196_v0  ;;  %s195_s20 = scalar_lea.vmem [#allocation7], %s339_s29  ;;  %s729_s24 = scalar_lea.hbm %s775_s2, %s347_s28  ;;  %v542_v14 = vmov 0.0  }
  0x56   : > { %s233_s14 = sshll.u32 %s195_s20, 4  ;;  %s220_s13 = scalar_lea.sflag [#allocation4], %s709_s5  ;;  %s724_s14 = int_to_ptr.vmem [resolvable:$true] %s233_s14 }
  0x57   : > { %v199_v2 = vsub.f32 0.0, %v198_v1  ;;  %v202_v9 = vsub.f32 %v200_v7, %v201_v8  ;;  %s467_s17 = scalar_lea.vmem %s724_s14, 256  ;;  %p788_p13 = scmp.ne.s32.totalorder %s780_s21, 0 }
  0x58   : > { %p468_p6 = scmp.ne.s32.totalorder %s724_s14, %s467_s17  ;;  %s543_s19 = smov [#allocation7]  }
  0x59   : > { %v203_v3 = vmul.f32 1.442695, %v199_v2  ;;  %s471_s23 = sshll.u32 %s543_s19, 4  ;;  %s472_s23 = int_to_ptr.vmem [resolvable:$false] %s471_s23 }
  0x5a   : > { %p469_p7 = pnand %p468_p6, %p788_p13  ;;  %s473_s25 = scalar_lea.vmem %s472_s23, 512 }
  0x5b   : > { %403 = vpow2.f32 %v203_v3  ;;  %p474_p8 = scmp.lt.s32.totalorder %s724_s14, %s472_s23  ;;  %p475_p9 = scmp.lt.s32.totalorder %s473_s25, %s467_s17 }
  0x5c   : > { %p470_p5 = pneg %p469_p7 }
  0x5d   : > { %p476_p0 = por %p475_p9, %p474_p8 }
  0x5f   : > { %p477_p1 = pnand %p476_p0, %p470_p5 }
  0x65   : > { %v404_v4 = vpop.eup %403 }
  0x66   : > { %v205_v5 = vadd.f32 1.0, %v404_v4 }
  0x68   : > { %405 = vlog2.f32 %v205_v5 }
  0x72   : > { %v406_v10 = vpop.eup %405 }
  0x73   : > { %v207_v11 = vmul.f32 0.6931472, %v406_v10 }
  0x75   : > { %v208_v12 = vadd.f32 %v207_v11, %v202_v9 }
  0x77   : > { %vm209_vm0 = vcmp.ne.f32.partialorder %v208_v12, %v208_v12 }
  0x78   : > { %vm210_vm2 = vmxor %vm209_vm0, %vm541_vm1 }
  0x79   : > { %v211_v13 = vsel %vm210_vm2, %v208_v12, 0.0  ;;  %v340_v15 = vsel %vm210_vm2, 1.0, %v542_v14 }
  0x7a   : > { %215 = vst [vmem:[%s195_s20] sm:$0xff] %v211_v13  ;;  %341 = vst [vmem:[%s195_s20 + $0x8] sm:$0xff] %v340_v15 }
  0x7b   : > { %480 = shalt.err (!%p477_p1)
}
  0x7c   : > { %s481_s26 = scalar_lea.hbm %s729_s24, 256  ;;  %s485_s8 = scalar_lea.hbm %s775_s2, 512 }
  0x7d   : > { %p482_p11 = scmp.ne.s32.totalorder %s729_s24, %s481_s26  ;;  %p486_p4 = scmp.lt.u32.totalorder %s729_s24, %s775_s2 }
  0x7e   : > { %p487_p10 = scmp.lt.u32.totalorder %s485_s8, %s481_s26  ;;  %p489_p6 = scmp.lt.u32.totalorder %s481_s26, %s729_s24 }
  0x7f   : > { %p483_p12 = pnand %p482_p11, %p788_p13 }
  0x80   : > { %p488_p3 = por %p487_p10, %p486_p4 }
  0x81   : > { %p484_p2 = pneg %p483_p12 }
  0x82   : > { %p490_p7 = por %p489_p6, %p488_p3 }
  0x84   : > { %p491_p5 = pnand %p490_p7, %p484_p2 }
  0x86   : > { %494 = shalt.err (!%p491_p5)
}
  0x87   : > { %s544_s7 = smov 128   ;;  %s545_s29 = smov 8  }
  0x88   : > { %352 = dma.vmem_to_hbm [thread:$0]  (%p788_p13), %s724_s14, 256, %s729_s24, %s220_s13, %s544_s7, %s544_s7, %s545_s29  }
  0x89 PF: > { %s248_s20 = sand.u32 1, %s525_s9   ;;  %p789_p8 = scmp.ne.s32.totalorder %s781_s22, 0 }
  0x8a   : > { %p790_p9 = scmp.ge.s32.totalorder %s537_s12, 2  ;;  %s249_s28 = scalar_lea.sflag [#allocation4], %s248_s20 }
  0x8c   : > { %p362_p0 = pnand %p790_p9, %p789_p8 }
  0x8e   : > { %520 = dma.done.wait (!%p362_p0), %s249_s28, 256  }
  0x8f   : > { %522 = vsyncadd (!%p362_p0), %s249_s28, 4294967040  ;;  %p18_p1 = scmp.ge.s32.totalorder %s586_s15, 4   ;;  %s791_s9 = smov %s529_s10 }
  0x90   : > { %s792_s10 = smov %s533_s11  ;;  %s793_s11 = smov %s598_s18 }
  0x91   : > { %s794_s12 = smov %s586_s15  ;;  %20 = sbr.rel (!%p18_p1) target bundleno = 7 (0x7), region = 87 }
  0x98   :  { %254 = vsyncpa [#allocation3], 1 }
  0x99   :  { %256 = vsyncpa [#allocation3 + $0x1], 1 }
  0x9a   :  { %257 = vsyncpa [#allocation6], 1 }
  0x9b   :  { %259 = vsyncpa [#allocation6 + $0x1], 1 }
  0x9c   :  { %260 = vsyncpa [#allocation4], 1 }
  0x9d   :  { %262 = vsyncpa [#allocation4 + $0x1], 1 }

</bundles_post_ra>
